<compile_context>
chip_gen: v7x
topology: tpu7x:2x2x1
jax: 0.10.0
libtpu: 0.0.40
codegen_flags: <defaults>
</compile_context>

<pallas_src>
import functools

import jax
import jax.numpy as jnp
from jax.experimental import pallas as pl
from jax.experimental.pallas import tpu as pltpu


_MAX_UNROLLED_CHUNKS = 32  # cap on the statically unrolled 128-lane accumulate loop


def _aspp_pooling_kernel(x_ref, w_ref, scale_ref, bias_ref, o_ref, acc_ref,
                         *, hw, t_hw):
    # x_ref:     (1, C_in, T_HW)    tile of x viewed as (N, C_in, H*W)
    # w_ref:     (C_in, C_out)      conv weight [C_out, C_in, 1, 1] transposed (input dtype)
    # scale_ref: (1, C_out) f32     gamma * rsqrt(var + eps)   (folded BN)
    # bias_ref:  (1, C_out) f32     beta - mean * scale        (folded BN)
    # o_ref:     (1, 1, C_out)
    # acc_ref:   (1, C_in, 128) f32 lane-preserving partial sums (persist across HW axis)
    hw_step = pl.program_id(1)
    n_hw = pl.num_programs(1)

    chunked = (t_hw % 128 == 0) and (t_hw // 128) <= _MAX_UNROLLED_CHUNKS
    has_tail = (hw % t_hw) != 0  # only possible when chunked (multi-tile) by construction

    @pl.when(hw_step == 0)
    def _():
        acc_ref[...] = jnp.zeros_like(acc_ref)

    if chunked:
        n_chunks = t_hw // 128

        def add_chunks(mask_tail):
            lane = None
            if mask_tail:
                # (1, 1, 128) iota; broadcasting handles C_in (no full-tile iota).
                lane = jax.lax.broadcasted_iota(jnp.int32, (1, 1, 128), 2)
            for k in range(n_chunks):
                chunk = x_ref[:, :, pl.ds(k * 128, 128)].astype(jnp.float32)
                if mask_tail:
                    valid = (hw_step * t_hw + k * 128 + lane) < hw
                    chunk = jnp.where(valid, chunk, 0.0)
                acc_ref[...] += chunk  # pure VPU add, no per-tile XLU reduce

        if has_tail:
            # Hot path: plain adds on every tile except the ragged last one.
            @pl.when(hw_step < n_hw - 1)
            def _():
                add_chunks(mask_tail=False)

            @pl.when(hw_step == n_hw - 1)
            def _():
                add_chunks(mask_tail=True)
        else:
            add_chunks(mask_tail=False)
    else:
        # Single whole-HW tile (t_hw == hw): one cross-lane reduce per batch element.
        acc_ref[:, :, 0:1] += jnp.sum(x_ref[...].astype(jnp.float32), axis=2,
                                      keepdims=True)

    @pl.when(hw_step == n_hw - 1)
    def _():
        # Single cross-lane reduce + relayout, once per batch element.
        pooled = jnp.sum(acc_ref[...], axis=2) * (1.0 / hw)          # (1, C_in) mean
        y = jnp.dot(pooled, w_ref[...].astype(jnp.float32),
                    preferred_element_type=jnp.float32)              # (1, C_out) 1x1 conv
        y = y * scale_ref[...] + bias_ref[...]                       # folded BatchNorm (eval)
        y = jnp.maximum(y, 0.0)                                      # ReLU
        o_ref[...] = y[None].astype(o_ref.dtype)                     # (1, 1, C_out)


def _pick_hw_tile(hw, c_in, itemsize, per_buffer_budget=8 * 1024 * 1024):
    """HW tile: whole HW if it fits an 8 MiB buffer, else a lane-aligned slab.

    8 MiB/buffer (x2 double buffering = 16 MiB for the streamed input) amortizes the
    ~0.35 us per-grid-step overhead while staying under the 32 MiB default scoped-VMEM
    limit (and v7x's 64 MiB physical VMEM) together with the resident weight buffers.
    """
    if c_in * hw * itemsize <= per_buffer_budget:
        return hw  # single tile per batch element; reduce happens once, in the epilogue
    t = (per_buffer_budget // (c_in * itemsize)) // 128 * 128
    t = max(128, min(t, _MAX_UNROLLED_CHUNKS * 128))
    return min(t, hw)


def aspp_pooling(x_nchw, conv_w, gamma, beta, running_mean, running_var, eps=1e-5):
    """x_nchw: (N, C_in, H, W); conv_w: (C_out, C_in, 1, 1). Returns (N, C_out, H, W)."""
    n, c_in, h, w = x_nchw.shape
    c_out = conv_w.shape[0]
    hw = h * w
    itemsize = jnp.dtype(x_nchw.dtype).itemsize

    # Contiguous view (no HBM data movement): NCHW -> (N, C_in, H*W).
    x_flat = x_nchw.reshape(n, c_in, hw)
    # Keep the conv weight in its input dtype (halves resident VMEM / one-time DMA
    # for bf16 weights); promotion to f32 happens only in the per-batch epilogue.
    w_mat = conv_w.reshape(c_out, c_in).T                                   # (C_in, C_out)

    # Fold eval-mode BatchNorm (running stats) into a single scale/bias pair.
    # Defensive reshape: accept (C,), (1, C) or (1, C, 1, 1) parameter shapes.
    # TODO(synk): norm_layer implemented as eval-mode BatchNorm2d; training-mode batch
    # statistics over the pooled 1x1 map are not implemented.
    g = jnp.asarray(gamma, jnp.float32).reshape(-1)
    b = jnp.asarray(beta, jnp.float32).reshape(-1)
    m = jnp.asarray(running_mean, jnp.float32).reshape(-1)
    v = jnp.asarray(running_var, jnp.float32).reshape(-1)
    scale_vec = g * jax.lax.rsqrt(v + eps)                                  # (C_out,)
    bias_vec = b - m * scale_vec                                            # (C_out,)
    scale = scale_vec.reshape(1, c_out)
    bias = bias_vec.reshape(1, c_out)

    t_hw = _pick_hw_tile(hw, c_in, itemsize)
    n_hw_tiles = pl.cdiv(hw, t_hw)
    assert (t_hw == hw) or (t_hw % 128 == 0 and t_hw // 128 <= _MAX_UNROLLED_CHUNKS)

    # VMEM budget: every input spec is double-buffered by default (including the
    # constant weight/scale/bias operands), plus the accumulator scratch and margin.
    w_itemsize = jnp.dtype(w_mat.dtype).itemsize
    vmem_need = (
        2 * c_in * t_hw * itemsize        # double-buffered streamed x tile
        + 2 * c_in * c_out * w_itemsize   # conv weight (double-buffered constant)
        + 2 * 2 * c_out * 4               # BN scale + bias (double-buffered constants)
        + 2 * c_out * itemsize            # tiny pooled output block
        + c_in * 128 * 4                  # lane-preserving f32 accumulator scratch
        + (2 << 20)                       # margin
    )
    vmem_limit = int(max(32 * 1024 * 1024, vmem_need))

    cost = pl.CostEstimate(
        flops=n * hw * c_in + 2 * n * c_in * c_out,
        transcendentals=0,
        bytes_accessed=(n * hw * c_in * itemsize          # streamed input (read once)
                        + c_in * c_out * w_itemsize       # weight
                        + 2 * c_out * 4                   # folded BN params
                        + n * c_out * itemsize),          # tiny pooled output
    )

    pooled = pl.pallas_call(
        functools.partial(_aspp_pooling_kernel, hw=hw, t_hw=t_hw),
        out_shape=jax.ShapeDtypeStruct((n, 1, c_out), x_nchw.dtype),
        grid=(n, n_hw_tiles),
        in_specs=[
            pl.BlockSpec((1, c_in, t_hw), lambda i, j: (i, 0, j)),   # x tiles (streamed)
            pl.BlockSpec((c_in, c_out), lambda i, j: (0, 0)),        # conv weight (resident)
            pl.BlockSpec((1, c_out), lambda i, j: (0, 0)),           # BN scale (resident)
            pl.BlockSpec((1, c_out), lambda i, j: (0, 0)),           # BN bias (resident)
        ],
        out_specs=pl.BlockSpec((1, 1, c_out), lambda i, j: (i, 0, 0)),
        scratch_shapes=[pltpu.VMEM((1, c_in, 128), jnp.float32)],
        compiler_params=pltpu.CompilerParams(
            dimension_semantics=("parallel", "arbitrary"),
            vmem_limit_bytes=vmem_limit,
        ),
        cost_estimate=cost,
    )(x_flat, w_mat, scale, bias)

    # Bilinear upsample of a 1x1 map with align_corners=True == spatial broadcast,
    # written straight in NCHW (single output HBM pass, no post-kernel transpose).
    y = pooled[:, 0, :]                                             # (N, C_out)
    return jnp.broadcast_to(y[:, :, None, None], (n, c_out, h, w))


def _reference(x_nchw, conv_w, gamma, beta, running_mean, running_var, eps=1e-5):
    g = jnp.asarray(gamma, jnp.float32).reshape(-1)
    b = jnp.asarray(beta, jnp.float32).reshape(-1)
    m = jnp.asarray(running_mean, jnp.float32).reshape(-1)
    v = jnp.asarray(running_var, jnp.float32).reshape(-1)
    pooled = jnp.mean(x_nchw.astype(jnp.float32), axis=(2, 3))          # (N, C_in)
    y = pooled @ conv_w.reshape(conv_w.shape[0], -1).T.astype(jnp.float32)
    y = (y - m) * (g * jax.lax.rsqrt(v + eps)) + b
    y = jnp.maximum(y, 0.0)                                             # (N, C_out)
    n, _, h, w = x_nchw.shape
    return jnp.broadcast_to(y[:, :, None, None], (n, y.shape[1], h, w)).astype(x_nchw.dtype)


if __name__ == "__main__":
    key = jax.random.PRNGKey(0)
    k_x, k_w, k_g, k_b, k_m, k_v = jax.random.split(key, 6)

    N, C_IN, C_OUT, H, W = 2, 4, 8, 16, 16

    x = jax.random.normal(k_x, (N, C_IN, H, W), dtype=jnp.float32)
    conv_w = jax.random.normal(k_w, (C_OUT, C_IN, 1, 1), dtype=jnp.float32) * 0.1
    # PyTorch-native 1-D BatchNorm parameter shapes (C_OUT,).
    gamma = jax.random.normal(k_g, (C_OUT,), dtype=jnp.float32) * 0.1 + 1.0
    beta = jax.random.normal(k_b, (C_OUT,), dtype=jnp.float32) * 0.1
    running_mean = jax.random.normal(k_m, (C_OUT,), dtype=jnp.float32) * 0.1
    running_var = jnp.abs(jax.random.normal(k_v, (C_OUT,), dtype=jnp.float32)) * 0.1 + 1.0

    out = aspp_pooling(x, conv_w, gamma, beta, running_mean, running_var)
    out = jax.block_until_ready(out)

    ref = _reference(x, conv_w, gamma, beta, running_mean, running_var)
    assert out.shape == (N, C_OUT, H, W)
    assert jnp.allclose(out, ref, atol=1e-5, rtol=1e-5)

    print("KERNEL_OK")
</pallas_src>

<mosaic_0001>
module attributes {stable_mosaic.version = 11 : i64} {
  func.func @_aspp_pooling_kernel(%arg0: i32, %arg1: i32, %arg2: memref<1x4x256xf32, #tpu.memory_space<vmem>>, %arg3: memref<4x8xf32, #tpu.memory_space<vmem>>, %arg4: memref<1x8xf32, #tpu.memory_space<vmem>>, %arg5: memref<1x8xf32, #tpu.memory_space<vmem>>, %arg6: memref<1x1x8xf32, #tpu.memory_space<vmem>>, %arg7: memref<1x4x128xf32, #tpu.memory_space<vmem>>) attributes {dimension_semantics = [#tpu.dimension_semantics<parallel>, #tpu.dimension_semantics<arbitrary>], iteration_bounds = array<i64: 2, 1>, scalar_prefetch = 0 : i64, scratch_operands = 1 : i64, tpu.core_type = #tpu.core_type<tc>, window_params = [{transform_indices = @transform_0, window_bounds = array<i64: 1, 4, 256>}, {pipeline_mode = #tpu.pipeline_mode<synchronous>, transform_indices = @transform_1, window_bounds = array<i64: 4, 8>}, {pipeline_mode = #tpu.pipeline_mode<synchronous>, transform_indices = @transform_2, window_bounds = array<i64: 1, 8>}, {pipeline_mode = #tpu.pipeline_mode<synchronous>, transform_indices = @transform_3, window_bounds = array<i64: 1, 8>}, {transform_indices = @transform_4, window_bounds = array<i64: 1, 1, 8>}]} {
    %c0_i32 = arith.constant 0 : i32
    %0 = arith.cmpi eq, %arg1, %c0_i32 : i32
    %1 = arith.extui %0 : i1 to i32
    %c0_i32_0 = arith.constant 0 : i32
    %2 = arith.cmpi ne, %1, %c0_i32_0 : i32
    scf.if %2 {
      %cst = arith.constant 0.000000e+00 : f32
      %14 = vector.broadcast %cst : f32 to vector<1x4x128xf32>
      %c0_19 = arith.constant 0 : index
      %c0_20 = arith.constant 0 : index
      %c0_21 = arith.constant 0 : index
      %15 = vector.load %arg7[%c0_19, %c0_20, %c0_21] : memref<1x4x128xf32, #tpu.memory_space<vmem>>, vector<1x4x128xf32>
      tpu.vector_store %arg7[%c0_19, %c0_20, %c0_21], %14 {strides = array<i32>} : memref<1x4x128xf32, #tpu.memory_space<vmem>>, vector<1x4x128xf32>,
    } else {
    }
    %c0 = arith.constant 0 : index
    %c0_1 = arith.constant 0 : index
    %c0_2 = arith.constant 0 : index
    %3 = vector.load %arg2[%c0, %c0_1, %c0_2] : memref<1x4x256xf32, #tpu.memory_space<vmem>>, vector<1x4x128xf32>
    %c0_3 = arith.constant 0 : index
    %c0_4 = arith.constant 0 : index
    %c0_5 = arith.constant 0 : index
    %4 = vector.load %arg7[%c0_3, %c0_4, %c0_5] : memref<1x4x128xf32, #tpu.memory_space<vmem>>, vector<1x4x128xf32>
    %5 = arith.addf %4, %3 : vector<1x4x128xf32>
    %c0_6 = arith.constant 0 : index
    %c0_7 = arith.constant 0 : index
    %c0_8 = arith.constant 0 : index
    %6 = vector.load %arg7[%c0_6, %c0_7, %c0_8] : memref<1x4x128xf32, #tpu.memory_space<vmem>>, vector<1x4x128xf32>
    tpu.vector_store %arg7[%c0_6, %c0_7, %c0_8], %5 {strides = array<i32>} : memref<1x4x128xf32, #tpu.memory_space<vmem>>, vector<1x4x128xf32>,
    %c0_9 = arith.constant 0 : index
    %c0_10 = arith.constant 0 : index
    %c128 = arith.constant 128 : index
    %7 = vector.load %arg2[%c0_9, %c0_10, %c128] : memref<1x4x256xf32, #tpu.memory_space<vmem>>, vector<1x4x128xf32>
    %c0_11 = arith.constant 0 : index
    %c0_12 = arith.constant 0 : index
    %c0_13 = arith.constant 0 : index
    %8 = vector.load %arg7[%c0_11, %c0_12, %c0_13] : memref<1x4x128xf32, #tpu.memory_space<vmem>>, vector<1x4x128xf32>
    %9 = arith.addf %8, %7 : vector<1x4x128xf32>
    %c0_14 = arith.constant 0 : index
    %c0_15 = arith.constant 0 : index
    %c0_16 = arith.constant 0 : index
    %10 = vector.load %arg7[%c0_14, %c0_15, %c0_16] : memref<1x4x128xf32, #tpu.memory_space<vmem>>, vector<1x4x128xf32>
    tpu.vector_store %arg7[%c0_14, %c0_15, %c0_16], %9 {strides = array<i32>} : memref<1x4x128xf32, #tpu.memory_space<vmem>>, vector<1x4x128xf32>,
    %c0_i32_17 = arith.constant 0 : i32
    %11 = arith.cmpi eq, %arg1, %c0_i32_17 : i32
    %12 = arith.extui %11 : i1 to i32
    %c0_i32_18 = arith.constant 0 : i32
    %13 = arith.cmpi ne, %12, %c0_i32_18 : i32
    scf.if %13 {
      %c0_19 = arith.constant 0 : index
      %c0_20 = arith.constant 0 : index
      %c0_21 = arith.constant 0 : index
      %14 = vector.load %arg7[%c0_19, %c0_20, %c0_21] : memref<1x4x128xf32, #tpu.memory_space<vmem>>, vector<1x4x128xf32>
      %cst = arith.constant dense<0.000000e+00> : vector<1x4xf32>
      %15 = vector.multi_reduction <add>, %14, %cst [2] : vector<1x4x128xf32> to vector<1x4xf32>
      %cst_22 = arith.constant 3.906250e-03 : f32
      %16 = vector.broadcast %cst_22 : f32 to vector<1x4xf32>
      %17 = arith.mulf %15, %16 : vector<1x4xf32>
      %c0_23 = arith.constant 0 : index
      %c0_24 = arith.constant 0 : index
      %18 = vector.load %arg3[%c0_23, %c0_24] : memref<4x8xf32, #tpu.memory_space<vmem>>, vector<4x8xf32>
      %cst_25 = arith.constant dense<0.000000e+00> : vector<1x8xf32>
      %19 = tpu.matmul %17, %18, %cst_25 {dimension_numbers = #tpu.dot_dimension_numbers<[1], [0], [0], [1], [0, 0, 1, 1], [], []>} : vector<1x4xf32>, vector<4x8xf32>, vector<1x8xf32> -> vector<1x8xf32>
      %c0_26 = arith.constant 0 : index
      %c0_27 = arith.constant 0 : index
      %20 = vector.load %arg4[%c0_26, %c0_27] : memref<1x8xf32, #tpu.memory_space<vmem>>, vector<1x8xf32>
      %21 = arith.mulf %19, %20 : vector<1x8xf32>
      %c0_28 = arith.constant 0 : index
      %c0_29 = arith.constant 0 : index
      %22 = vector.load %arg5[%c0_28, %c0_29] : memref<1x8xf32, #tpu.memory_space<vmem>>, vector<1x8xf32>
      %23 = arith.addf %21, %22 : vector<1x8xf32>
      %cst_30 = arith.constant 0.000000e+00 : f32
      %24 = vector.broadcast %cst_30 : f32 to vector<1x8xf32>
      %25 = arith.maximumf %23, %24 : vector<1x8xf32>
      %26 = vector.shape_cast %25 : vector<1x8xf32> to vector<1x1x8xf32>
      %c0_31 = arith.constant 0 : index
      %c0_32 = arith.constant 0 : index
      %c0_33 = arith.constant 0 : index
      %27 = vector.load %arg6[%c0_31, %c0_32, %c0_33] : memref<1x1x8xf32, #tpu.memory_space<vmem>>, vector<1x1x8xf32>
      tpu.vector_store %arg6[%c0_31, %c0_32, %c0_33], %26 {strides = array<i32>} : memref<1x1x8xf32, #tpu.memory_space<vmem>>, vector<1x1x8xf32>,
    } else {
    }
    return
  }
  func.func @transform_0(%arg0: i32, %arg1: i32) -> (i32, i32, i32) {
    %c0_i32 = arith.constant 0 : i32
    %c0_i32_0 = arith.constant 0 : i32
    return %arg0, %c0_i32, %arg1 : i32, i32, i32
  }
  func.func @transform_1(%arg0: i32, %arg1: i32) -> (i32, i32) {
    %c0_i32 = arith.constant 0 : i32
    %c0_i32_0 = arith.constant 0 : i32
    %c0_i32_1 = arith.constant 0 : i32
    return %c0_i32, %c0_i32_0 : i32, i32
  }
  func.func @transform_2(%arg0: i32, %arg1: i32) -> (i32, i32) {
    %c0_i32 = arith.constant 0 : i32
    %c0_i32_0 = arith.constant 0 : i32
    %c0_i32_1 = arith.constant 0 : i32
    return %c0_i32, %c0_i32_0 : i32, i32
  }
  func.func @transform_3(%arg0: i32, %arg1: i32) -> (i32, i32) {
    %c0_i32 = arith.constant 0 : i32
    %c0_i32_0 = arith.constant 0 : i32
    %c0_i32_1 = arith.constant 0 : i32
    return %c0_i32, %c0_i32_0 : i32, i32
  }
  func.func @transform_4(%arg0: i32, %arg1: i32) -> (i32, i32, i32) {
    %c0_i32 = arith.constant 0 : i32
    %c0_i32_0 = arith.constant 0 : i32
    %c0_i32_1 = arith.constant 0 : i32
    return %arg0, %c0_i32, %c0_i32_0 : i32, i32, i32
  }
}

</mosaic_0001>

<bundles_post_ra>
// kernel: tpu_custom_call.1
= control target key start
LH: loop header
LB: loop body
LE: loop exit
PB: predicated region body
PF: predicated region fallthrough
CT: control target
= control target key end

     0   :  { %9 = vsyncpa [#allocation4], 0  ;;  %s954_s0 = inlined_call_operand.hbm [shape: f32[2,4,256], index: 0, kind: input, shape index: {}]   ;;  %s955_s1 = inlined_call_operand.hbm [shape: f32[4,8], index: 1, kind: input, shape index: {}]   ;;  %s956_s2 = inlined_call_operand.vmem [shape: f32[1,8], index: 2, kind: input, shape index: {}]   ;;  %s957_s3 = inlined_call_operand.vmem [shape: f32[1,8], index: 3, kind: input, shape index: {}]   ;;  %s958_s4 = inlined_call_operand.hbm [shape: f32[2,1,8], index: 4, kind: output, shape index: {}]  }
   0x1   :  { %11 = vsyncpa [#allocation4 + $0x1], 0 }
   0x2   :  { %12 = vsyncpa [#allocation7], 0 }
   0x3   :  { %13 = vsyncpa [#allocation5], 0 }
   0x4   :  { %15 = vsyncpa [#allocation5 + $0x1], 0  ;;  %s731_s15 = smov 0   ;;  %s733_s16 = smov 0  }
   0x5   :  { %s735_s17 = smov 0   ;;  %s737_s18 = smov 0  }
   0x6   :  { %s739_s19 = smov 0   ;;  %s741_s20 = smov 0  }
   0x7 LB: > { %s456_s21 = sadd.s32 4294967295, %s699_s20   ;;  %s457_s22 = sadd.s32 4294967294, %s699_s20   ;;  %s699_s20 = sphi %s741_s20, %s21_s20   ;;  %s695_s19 = sphi %s739_s19, %s983_s19   ;;  %s691_s18 = sphi %s737_s18, %s982_s18   ;;  %s687_s17 = sphi %s735_s17, %s981_s17   ;;  %s683_s16 = sphi %s733_s16, %s980_s16   ;;  %s679_s15 = sphi %s731_s15, %s979_s15  }
   0x8   : > { %p55_p0 = scmp.ne.s32.totalorder %s683_s16, %s679_s15  ;;  %p765_p1 = scmp.eq.s32.totalorder %s456_s21, 0 }
   0x9   : > { %p769_p2 = scmp.eq.s32.totalorder %s456_s21, 1  ;;  %p148_p3 = scmp.eq.s32.totalorder %s457_s22, 1 }
   0xa   : > { %s963_s23 = scalar_select %p765_p1, 1, 0 }
   0xb   : > { %s964_s24 = scalar_select %p769_p2, 1, 0 }
   0xc   : > { %p775_p4 = por %p765_p1, %p55_p0  ;;  %p458_p5 = scmp.ge.s32.totalorder %s699_s20, 1 }
   0xd   : > { %p780_p6 = por %p148_p3, %p55_p0  ;;  %p155_p7 = scmp.lt.s32.totalorder %s699_s20, 3 }
   0xe   : > { %s965_s25 = scalar_select %p775_p4, 1, 0 }
   0xf   : > { %s966_s26 = scalar_select %p780_p6, 1, 0 }
  0x10   : > { %p785_p8 = pnand %p458_p5, %p155_p7  ;;  %s701_s28 = smov [#allocation6]  }
  0x11   : > { %s168_s29 = sshll.u32 %s701_s28, 4  ;;  %s33_s5 = sadd.s32 1, %s695_s19  ;;  %s169_s29 = int_to_ptr.vmem [resolvable:$true] %s168_s29 }
  0x12   : > { %s967_s27 = scalar_select %p785_p8, 1, 0 }
  0x13   : > { %p488_p10 = pneg %p785_p8  ;;  %s42_s6 = sadd.s32 1, %s687_s17 }
  0x14   : > { %p800_p12 = scmp.ge.s32.totalorder %s33_s5, 2  ;;  %s555_s10 = scalar_lea.hbm %s955_s1, 64 }
  0x15   : > { %p794_p11 = pnand %p488_p10, %p765_p1  ;;  %p556_p13 = scmp.ne.s32.totalorder %s955_s1, %s555_s10 }
  0x16   : > { %s969_s7 = scalar_select %p800_p12, 1, 0 }
  0x17   : > { %p557_p0 = pneg %p794_p11  ;;  %p562_p7 = scmp.lt.u32.totalorder %s555_s10, %s955_s1 }
  0x19   : > { %p558_p3 = pnand %p557_p0, %p556_p13 }
  0x1b   : > { %p559_p5 = pneg %p558_p3 }
  0x1d   : > { %p564_p10 = pnand %p562_p7, %p559_p5 }
  0x1f   : > { %567 = shalt.err (!%p564_p10)
}
  0x20   : > { %s568_s21 = scalar_lea.vmem %s169_s29, 64  ;;  %p576_p4 = scmp.lt.s32.totalorder %s169_s29, %s169_s29 }
  0x21   : > { %p569_p9 = scmp.ne.s32.totalorder %s169_s29, %s568_s21  ;;  %p577_p8 = scmp.lt.s32.totalorder %s568_s21, %s568_s21 }
  0x23   : > { %p571_p6 = pnand %p569_p9, %p557_p0  ;;  %p578_p2 = por %p577_p8, %p576_p4 }
  0x25   : > { %p572_p1 = pneg %p571_p6 }
  0x27   : > { %p579_p12 = pnand %p578_p2, %p572_p1 }
  0x29   : > { %582 = shalt.err (!%p579_p12)
}
  0x2a   : > { %491 = dma.hbm_to_vmem [thread:$0]  (!%p794_p11), %s955_s1, 64, %s169_s29, [#allocation7]  }
  0x2b   : > { %p970_p4 = scmp.ne.s32.totalorder %s969_s7, 0  ;;  %p49_p1 = scmp.ne.s32.totalorder %s687_s17, %s683_s16 }
  0x2c   : > { %p50_p2 = scmp.eq.s32.totalorder %s699_s20, 0  ;;  %p501_p6 = scmp.lt.s32.totalorder %s699_s20, 2 }
  0x2d   : > { %s985_s5 = smov (%p970_p4, %s33_s5), 0  ;;  %p971_p12 = scmp.ne.s32.totalorder %s964_s24, 0 }
  0x2e   : > { %s37_s30 = ssub.s32 %s695_s19, %s985_s5  ;;  %p51_p9 = por %p50_p2, %p49_p1 }
  0x2f   : > { %p40_p8 = scmp.eq.s32.totalorder %s37_s30, 0  ;;  %p832_p13 = por %p971_p12, %p49_p1 }
  0x30   : > { %s185_s9 = sand.u32 1, %s687_s17   ;;  %s472_s7 = sshll.u32 %s695_s19, 7 }
  0x31   : > { %s840_s10 = scalar_select %p40_p8, %s687_s17, %s42_s6  }
  0x32   : > { %s461_s29 = sshll.u32 %s185_s9, 3  ;;  %s846_s13 = scalar_lea.hbm %s954_s0, %s472_s7 }
  0x33   : > { %s189_s24 = scalar_lea.vmem [#allocation3], %s461_s29  ;;  %p850_p11 = pnand %p501_p6, %p51_p9 }
  0x34   : > { %s199_s14 = sshll.u32 %s189_s24, 4  ;;  %s186_s6 = scalar_lea.sflag [#allocation4], %s185_s9  ;;  %s848_s14 = int_to_ptr.vmem [resolvable:$true] %s199_s14 }
  0x35   : > { %s583_s22 = scalar_lea.hbm %s846_s13, 128  ;;  %p585_p3 = pneg %p850_p11 }
  0x36   : > { %p584_p0 = scmp.ne.s32.totalorder %s846_s13, %s583_s22  ;;  %s588_s29 = scalar_lea.hbm %s954_s0, 256 }
  0x37   : > { %p589_p10 = scmp.lt.u32.totalorder %s846_s13, %s954_s0  ;;  %p590_p4 = scmp.lt.u32.totalorder %s588_s29, %s583_s22 }
  0x38   : > { %p586_p5 = pnand %p585_p3, %p584_p0  ;;  %p592_p2 = scmp.lt.u32.totalorder %s583_s22, %s846_s13 }
  0x39   : > { %p591_p1 = por %p590_p4, %p589_p10 }
  0x3a   : > { %p587_p7 = pneg %p586_p5 }
  0x3b   : > { %p593_p6 = por %p592_p2, %p591_p1 }
  0x3d   : > { %p594_p8 = pnand %p593_p6, %p587_p7 }
  0x3f   : > { %597 = shalt.err (!%p594_p8)
}
  0x40   : > { %s598_s9 = scalar_lea.vmem %s848_s14, 128  ;;  %s702_s12 = smov [#allocation3]  }
  0x41   : > { %p599_p9 = scmp.ne.s32.totalorder %s848_s14, %s598_s9  ;;  %s603_s24 = sshll.u32 %s702_s12, 4  ;;  %s604_s24 = int_to_ptr.vmem [resolvable:$false] %s603_s24 }
  0x42   : > { %s605_s28 = scalar_lea.vmem %s604_s24, 256  ;;  %p606_p5 = scmp.lt.s32.totalorder %s848_s14, %s604_s24 }
  0x43   : > { %p601_p12 = pnand %p599_p9, %p585_p3  ;;  %p607_p10 = scmp.lt.s32.totalorder %s605_s28, %s598_s9 }
  0x45   : > { %p602_p0 = pneg %p601_p12  ;;  %p608_p4 = por %p607_p10, %p606_p5 }
  0x47   : > { %p609_p1 = pnand %p608_p4, %p602_p0 }
  0x49   : > { %612 = shalt.err (!%p609_p1)
}
  0x4a   : > { %495 = dma.hbm_to_vmem [thread:$0]  (!%p850_p11), %s846_s13, 128, %s848_s14, %s186_s6  }
  0x4b   : > { %p974_p7 = scmp.ne.s32.totalorder %s967_s27, 0 }
  0x4c   : > { %s882_s22 = sand.u32 (!%p974_p7), 1, %s683_s16   ;;  %p975_p3 = scmp.ne.s32.totalorder (!%p974_p7), %s965_s25, 0 }
  0x4d   : > { %208 = sbr.rel (%p974_p7) target bundleno = 496 (0x1f0), region = 36  ;;  %s465_s30 = sshll.u32 (!%p974_p7), %s882_s22, 3 }
  0x4e   : > { %s211_s29 = scalar_lea.sflag (!%p974_p7), [#allocation4], %s882_s22  ;;  %s214_s7 = scalar_lea.vmem (!%p974_p7), [#allocation3], %s465_s30 }
  0x54   : > { %666 = dma.done.wait (%p975_p3), %s211_s29, 128  }
  0x55   : > { %668 = vsyncadd (%p975_p3), %s211_s29, 4294967168  ;;  %p976_p2 = scmp.ne.s32.totalorder %s963_s23, 0 }
  0x57   : > { %670 = dma.done.wait (%p976_p2), [#allocation7], 64  }
  0x58   : > { %672 = vsyncadd (%p976_p2), [#allocation7], 4294967232  ;;  %v703_v0 = vmov 0.0   ;;  %v248_v1 = vld [vmem:[%s214_s7] sm:$0xf]  ;;  %vm260_vm0 = vcmask 1043456   ;;  %v267_v10 = vlaneseq }
  0x59   : > { %247 = vst [vmem:[#allocation2] sm:$0xf] %v703_v0  ;;  %475 = vmatprep.subr.mxu0 %v703_v0  ;;  %v252_v4 = vld [vmem:[%s214_s7 + $0x4] sm:$0xf]  ;;  %v265_v9 = vld [vmem:[#allocation6] sm:$0xf] }
  0x5a   : > { %476 = vmatpush3.msk.msra.mxu0 %vm260_vm0, %v265_v9  ;;  %vm704_vm1 = vmmov 0   ;;  %v268_v11 = vand.u32 127, %v267_v10  ;;  %v270_v12 = vshrl.u32 %v267_v10, 7  ;;  %vm273_vm2 = vcmask 31744   ;;  %v349_v17 = vld [vmem:[%s956_s2] sm:$0x1] }
  0x5b   : > { %477 = vmatprep.mubr.msk.f32.mxu0 %vm704_vm1, %v703_v0  ;;  %v351_v19 = vld [vmem:[%s957_s3] sm:$0x1]  ;;  %s469_s14 = sshll.u32 %s691_s18, 4  ;;  %s241_s21 = scalar_lea.vmem [#allocation8], %s882_s22  ;;  %vm354_vm3 = vcmask 57344  }
  0x5c   : > { %v271_v13 = vsub.s32 %v268_v11, %v270_v12  ;;  %s369_s6 = sshll.u32 %s241_s21, 4  ;;  %s905_s12 = scalar_lea.hbm %s958_s4, %s469_s14  ;;  %s907_s6 = int_to_ptr.vmem [resolvable:$true] %s369_s6 }
  0x5d   : > { %s357_s24 = scalar_lea.sflag [#allocation5], %s882_s22  ;;  %s613_s28 = scalar_lea.vmem %s907_s6, 16 }
  0x5e   : > { %p614_p11 = scmp.ne.s32.totalorder %s907_s6, %s613_s28  ;;  %s705_s18 = smov [#allocation8]  }
  0x5f   : > { %s617_s30 = sshll.u32 %s705_s18, 4  ;;  %s618_s30 = int_to_ptr.vmem [resolvable:$false] %s617_s30 }
  0x60   : > { %v249_v2 = vld [vmem:[#allocation2] sm:$0xf]  ;;  %p615_p6 = pnand %p614_p11, %p832_p13  ;;  %s619_s29 = scalar_lea.vmem %s618_s30, 32 }
  0x61   : > { %v250_v3 = vadd.f32 %v249_v2, %v248_v1  ;;  %p620_p9 = scmp.lt.s32.totalorder %s907_s6, %s618_s30  ;;  %p621_p12 = scmp.lt.s32.totalorder %s619_s29, %s613_s28 }
  0x62   : > { %p616_p8 = pneg %p615_p6 }
  0x63   : > { %251 = vst [vmem:[#allocation2] sm:$0xf] %v250_v3  ;;  %p622_p0 = por %p621_p12, %p620_p9 }
  0x65   : > { %p623_p5 = pnand %p622_p0, %p616_p8 }
  0x6a   : > { %v253_v5 = vld [vmem:[#allocation2] sm:$0xf] }
  0x6b   : > { %v254_v6 = vadd.f32 %v253_v5, %v252_v4 }
  0x6d   : > { %255 = vst [vmem:[#allocation2] sm:$0xf] %v254_v6 }
  0x74   : > { %v259_v7 = vld [vmem:[#allocation2] sm:$0xf] }
  0x75   : > { %v261_v8 = vsel %vm260_vm0, %v259_v7, 0.0 }
  0x76   : > { %262 = vadd.xlane.f32.xlu0 %v261_v8 }
 0x103   : > { %v263_v14 = vpop.xlane.xlu0 %262 }
 0x104   : > { %v264_v15 = vmul.f32 0.00390625, %v263_v14 }
 0x106   : > { %v272_v16 = vrot.slane %v264_v15, %v271_v13 }
 0x108   : > { %478 = vmatmul.mubr.msk.f32.vlgmr.msra.gmra.mrb[0].mxu0 %vm273_vm2, %v272_v16 }
 0x1db   : > { %v345_v18 = vpop.f32.mrb[0].mxu0 }
 0x1dc   : > { %v350_v20 = vmul.f32 %v349_v17, %v345_v18  ;;  %v479_v21 = vpop.f32.mrb[1].mxu0 }
 0x1de   : > { %v352_v22 = vadd.f32 %v351_v19, %v350_v20 }
 0x1e0   : > { %v353_v23 = vmax.f32 %v352_v22, 0.0 }
 0x1e2   : > { %355 = vst.msk [vmem:[%s241_s21] sm:$0x1] %vm354_vm3, %v353_v23 }
 0x1e3   : > { %626 = shalt.err (!%p623_p5)
}
 0x1e4   : > { %s627_s22 = scalar_lea.hbm %s905_s12, 16  ;;  %s631_s25 = scalar_lea.hbm %s958_s4, 32 }
 0x1e5   : > { %p628_p10 = scmp.ne.s32.totalorder %s905_s12, %s627_s22  ;;  %p632_p7 = scmp.lt.u32.totalorder %s905_s12, %s958_s4 }
 0x1e6   : > { %p633_p3 = scmp.lt.u32.totalorder %s631_s25, %s627_s22  ;;  %p635_p11 = scmp.lt.u32.totalorder %s627_s22, %s905_s12 }
 0x1e7   : > { %p629_p4 = pnand %p628_p10, %p832_p13 }
 0x1e8   : > { %p634_p2 = por %p633_p3, %p632_p7 }
 0x1e9   : > { %p630_p1 = pneg %p629_p4 }
 0x1ea   : > { %p636_p6 = por %p635_p11, %p634_p2 }
 0x1ec   : > { %p637_p8 = pnand %p636_p6, %p630_p1 }
 0x1ee   : > { %640 = shalt.err (!%p637_p8)
}
 0x1ef   : > { %486 = dma.vmem_to_hbm [thread:$0]  (%p832_p13), %s907_s6, 16, %s905_s12, %s357_s24  }
 0x1f0 PF: > { %s381_s14 = sand.u32 1, %s679_s15   ;;  %p977_p9 = scmp.ne.s32.totalorder %s966_s26, 0 }
 0x1f1   : > { %p978_p12 = scmp.ge.s32.totalorder %s699_s20, 2  ;;  %s382_s21 = scalar_lea.sflag [#allocation5], %s381_s14 }
 0x1f3   : > { %p497_p0 = pnand %p978_p12, %p977_p9 }
 0x1f5   : > { %674 = dma.done.wait (!%p497_p0), %s382_s21, 16  }
 0x1f6   : > { %676 = vsyncadd (!%p497_p0), %s382_s21, 4294967280  ;;  %s21_s20 = sadd.s32 1, %s699_s20   ;;  %s979_s15 = smov %s683_s16 }
 0x1f7   : > { %p18_p5 = scmp.ge.s32.totalorder %s21_s20, 4   ;;  %s980_s16 = smov %s687_s17 }
 0x1f8   : > { %s981_s17 = smov %s840_s10  ;;  %s982_s18 = smov %s695_s19 }
 0x1f9   : > { %s983_s19 = smov %s985_s5  ;;  %20 = sbr.rel (!%p18_p5) target bundleno = 7 (0x7), region = 93 }
 0x200   :  { %386 = vsyncpa [#allocation4], 1 }
 0x201   :  { %388 = vsyncpa [#allocation4 + $0x1], 1 }
 0x202   :  { %389 = vsyncpa [#allocation7], 1 }
 0x203   :  { %390 = vsyncpa [#allocation5], 1 }
 0x204   :  { %392 = vsyncpa [#allocation5 + $0x1], 1 }

</bundles_post_ra>
